<compile_context>
chip_gen: v6e
topology: v6e:2x2x1
jax: 0.10.0
libtpu: 0.0.40
codegen_flags: <defaults>
</compile_context>

<pallas_src>
from functools import partial

import numpy as np
import jax
import jax.numpy as jnp
from jax.experimental import pallas as pl
from jax.experimental.pallas import tpu as pltpu

LANES = 128                  # TPU lane width; hidden and action dims are zero-padded to this.
BATCH_BLOCK = 512            # rows per grid step in the large-batch (gridded) path
GRID_BATCH_THRESHOLD = 1024  # below this, a single grid-less invocation is fastest


def _x_cols(num_obs):
    """Padded x width: num_obs features + 1 ones column, rounded up to 8 sublanes."""
    return max(8, ((num_obs + 1 + 7) // 8) * 8)


def _slab_layout(num_obs):
    """Row offsets of the packed parameter slab (each block 8-row aligned)."""
    xc = _x_cols(num_obs)
    w1_off = 0
    w2_off = xc
    w3_off = xc + LANES
    total_rows = xc + 2 * LANES
    return w1_off, w2_off, w3_off, total_rows


def pack_params(params, num_obs, hidden, num_actions):
    """Pack w1,b1,w2,b2,w3,b3 into one zero-padded (rows, 128) f32 slab.

    Bias folding: lane index `hidden` is a reserved "ones" lane.
      * x carries a constant 1.0 at column `num_obs` (see torch_network_forward), so slab
        row `num_obs` of the W1 block holds b1 -> layer 1 needs no broadcast bias add.  That
        row also writes 1.0 into the ones lane, so h1[:, hidden] == ReLU(1) == 1.
      * Row `hidden` of the W2 block holds b2 (and re-seeds the ones lane); row `hidden` of
        the W3 block holds b3.  All other padding is exactly zero, so padded lanes stay zero
        through K-padding and ReLU and the folded bias adds are exact.
    """
    if hidden >= LANES:
        raise ValueError(
            f"bias-folding scheme requires hidden <= {LANES - 1} (ones lane must be a "
            f"padded lane); got hidden={hidden}. Use explicit bias adds for hidden == 128.")
    if num_actions > LANES:
        raise ValueError(f"num_actions must be <= {LANES}, got {num_actions}")

    one = hidden  # reserved "ones" lane
    w1_off, w2_off, w3_off, total = _slab_layout(num_obs)
    slab = np.zeros((total, LANES), np.float32)
    # layer 1: weights + folded b1 (paired with the ones column of the padded x)
    slab[w1_off:w1_off + num_obs, :hidden] = np.asarray(params["w1"])
    slab[w1_off + num_obs, :hidden] = np.asarray(params["b1"]).reshape(-1)
    slab[w1_off + num_obs, one] = 1.0           # seed the ones lane of h1
    # layer 2: weights + folded b2
    slab[w2_off:w2_off + hidden, :hidden] = np.asarray(params["w2"])
    slab[w2_off + one, :hidden] = np.asarray(params["b2"]).reshape(-1)
    slab[w2_off + one, one] = 1.0               # propagate the ones lane to h2
    # layer 3: weights + folded b3
    slab[w3_off:w3_off + hidden, :num_actions] = np.asarray(params["w3"])
    slab[w3_off + one, :num_actions] = np.asarray(params["b3"]).reshape(-1)
    return jnp.asarray(slab)


def _make_kernel(x_cols, w2_off, w3_off):
    def kernel(x_ref, p_ref, o_ref):
        # Layer 1: bias already folded via the ones column of x; 8-sublane-aligned K slice.
        h = jnp.dot(x_ref[...], p_ref[0:x_cols, :], preferred_element_type=jnp.float32)
        h = jnp.maximum(h, 0.0)                             # ones lane: ReLU(1) == 1
        # Layer 2 (+ folded b2) -> ReLU.
        h = jnp.maximum(
            jnp.dot(h, p_ref[w2_off:w2_off + LANES, :],
                    preferred_element_type=jnp.float32), 0.0)
        # Layer 3 (+ folded b3): lane-dense (B, 128) store.
        o_ref[...] = jnp.dot(h, p_ref[w3_off:w3_off + LANES, :],
                             preferred_element_type=jnp.float32)
    return kernel


@partial(jax.jit, static_argnames=("num_obs", "num_actions"))
def torch_network_forward(x, packed_params, *, num_obs, num_actions):
    """Fused forward pass. x: (batch, num_obs) f32 -> (batch, num_actions) f32.

    The pad (ones column) and the final slice live inside this jit, so they fuse with the
    pallas_call; nest this function inside the caller's jit to amortize dispatch further.
    """
    batch = x.shape[0]
    xc = _x_cols(num_obs)
    _, w2_off, w3_off, total_rows = _slab_layout(num_obs)
    kernel = _make_kernel(xc, w2_off, w3_off)

    # x zero-padded to the 8-aligned width xc, with a constant 1.0 at column num_obs
    # (this is what folds b1 into the first matmul).
    xp = jnp.pad(x.astype(jnp.float32), ((0, 0), (0, xc - num_obs)))
    xp = xp.at[:, num_obs].set(1.0)

    # Advisory cost estimate: actual padded MXU work + actual bytes moved.
    flops = 2 * batch * LANES * (xc + 2 * LANES)
    bytes_accessed = 4 * (batch * xc + packed_params.size + batch * LANES)
    cost = pl.CostEstimate(flops=flops, transcendentals=0, bytes_accessed=bytes_accessed)

    if batch < GRID_BATCH_THRESHOLD:
        # Grid-less path: whole problem is a few hundred KiB -> single invocation,
        # 2 input DMAs (x + slab), one lane-dense output store.
        vmem = pl.BlockSpec(memory_space=pltpu.MemorySpace.VMEM)
        out_padded = pl.pallas_call(
            kernel,
            out_shape=jax.ShapeDtypeStruct((batch, LANES), jnp.float32),
            in_specs=[vmem, vmem],
            out_specs=vmem,
            compiler_params=pltpu.CompilerParams(vmem_limit_bytes=4 << 20),
            cost_estimate=cost,
        )(xp, packed_params)
    else:
        # Large-batch path (training / vectorized envs): 1-D batch grid marked "parallel"
        # so both TensorCores on v7x split it.  Slab block index is constant -> fetched once.
        bp = ((batch + BATCH_BLOCK - 1) // BATCH_BLOCK) * BATCH_BLOCK
        xp = jnp.pad(xp, ((0, bp - batch), (0, 0)))
        out_padded = pl.pallas_call(
            kernel,
            out_shape=jax.ShapeDtypeStruct((bp, LANES), jnp.float32),
            grid=(bp // BATCH_BLOCK,),
            in_specs=[pl.BlockSpec((BATCH_BLOCK, xc), lambda i: (i, 0)),
                      pl.BlockSpec((total_rows, LANES), lambda i: (0, 0))],
            out_specs=pl.BlockSpec((BATCH_BLOCK, LANES), lambda i: (i, 0)),
            compiler_params=pltpu.CompilerParams(
                dimension_semantics=("parallel",), vmem_limit_bytes=4 << 20),
            cost_estimate=cost,
        )(xp, packed_params)

    return out_padded[:batch, :num_actions]


def init_params(key, num_obs, hidden, num_actions):
    """Deterministic init matching torch.nn.Linear default U(-1/sqrt(fan_in), +1/sqrt(fan_in))."""
    def linear(key, fan_in, fan_out):
        kw, kb = jax.random.split(key)
        bound = 1.0 / np.sqrt(fan_in)
        # Stored as (in, out) == transpose of PyTorch's (out, in) weight.
        w = jax.random.uniform(kw, (fan_in, fan_out), jnp.float32, -bound, bound)
        b = jax.random.uniform(kb, (1, fan_out), jnp.float32, -bound, bound)
        return w, b

    k1, k2, k3 = jax.random.split(key, 3)
    w1, b1 = linear(k1, num_obs, hidden)
    w2, b2 = linear(k2, hidden, hidden)
    w3, b3 = linear(k3, hidden, num_actions)
    return {"w1": w1, "b1": b1, "w2": w2, "b2": b2, "w3": w3, "b3": b3}


def reference_forward(x, p):
    h1 = jnp.maximum(x @ p["w1"] + p["b1"], 0.0)
    h2 = jnp.maximum(h1 @ p["w2"] + p["b2"], 0.0)
    return h2 @ p["w3"] + p["b3"]


if __name__ == "__main__":
    # CartPole-like env: observation_space.shape = (4,), action_space.n = 2, hidden=30 (default).
    num_obs, hidden, num_actions = 4, 30, 2

    key = jax.random.PRNGKey(0)
    k_params, k_x_small, k_x_big = jax.random.split(key, 3)
    params = init_params(k_params, num_obs, hidden, num_actions)
    packed = pack_params(params, num_obs, hidden, num_actions)   # one-time packing

    # Small batch (typical env step / small minibatch) -> grid-less path.
    x_small = jax.random.normal(k_x_small, (8, num_obs), dtype=jnp.float32)
    q_small = jax.block_until_ready(
        torch_network_forward(x_small, packed, num_obs=num_obs, num_actions=num_actions))
    np.testing.assert_allclose(np.asarray(q_small),
                               np.asarray(reference_forward(x_small, params)),
                               rtol=1e-5, atol=1e-5)

    # Large batch (training / vectorized envs) -> batch-gridded "parallel" path.
    x_big = jax.random.normal(k_x_big, (2048, num_obs), dtype=jnp.float32)
    q_big = jax.block_until_ready(
        torch_network_forward(x_big, packed, num_obs=num_obs, num_actions=num_actions))
    np.testing.assert_allclose(np.asarray(q_big),
                               np.asarray(reference_forward(x_big, params)),
                               rtol=1e-5, atol=1e-5)

    print("KERNEL_OK")
</pallas_src>

<mosaic_0001>
module attributes {stable_mosaic.version = 11 : i64} {
  func.func @kernel(%arg0: memref<8x8xf32, #tpu.memory_space<vmem>>, %arg1: memref<264x128xf32, #tpu.memory_space<vmem>>, %arg2: memref<8x128xf32, #tpu.memory_space<vmem>>) attributes {dimension_semantics = [], scalar_prefetch = 0 : i64, scratch_operands = 0 : i64, tpu.core_type = #tpu.core_type<tc>} {
    %c0 = arith.constant 0 : index
    %c0_0 = arith.constant 0 : index
    %0 = vector.load %arg0[%c0, %c0_0] : memref<8x8xf32, #tpu.memory_space<vmem>>, vector<8x8xf32>
    %c0_1 = arith.constant 0 : index
    %c0_2 = arith.constant 0 : index
    %1 = vector.load %arg1[%c0_1, %c0_2] : memref<264x128xf32, #tpu.memory_space<vmem>>, vector<8x128xf32>
    %cst = arith.constant dense<0.000000e+00> : vector<8x128xf32>
    %2 = tpu.matmul %0, %1, %cst {dimension_numbers = #tpu.dot_dimension_numbers<[1], [0], [0], [1], [0, 0, 1, 1], [], []>} : vector<8x8xf32>, vector<8x128xf32>, vector<8x128xf32> -> vector<8x128xf32>
    %cst_3 = arith.constant 0.000000e+00 : f32
    %3 = vector.broadcast %cst_3 : f32 to vector<8x128xf32>
    %4 = arith.maximumf %2, %3 : vector<8x128xf32>
    %c8 = arith.constant 8 : index
    %c0_4 = arith.constant 0 : index
    %5 = vector.load %arg1[%c8, %c0_4] : memref<264x128xf32, #tpu.memory_space<vmem>>, vector<128x128xf32>
    %cst_5 = arith.constant dense<0.000000e+00> : vector<8x128xf32>
    %6 = tpu.matmul %4, %5, %cst_5 {dimension_numbers = #tpu.dot_dimension_numbers<[1], [0], [0], [1], [0, 0, 1, 1], [], []>} : vector<8x128xf32>, vector<128x128xf32>, vector<8x128xf32> -> vector<8x128xf32>
    %cst_6 = arith.constant 0.000000e+00 : f32
    %7 = vector.broadcast %cst_6 : f32 to vector<8x128xf32>
    %8 = arith.maximumf %6, %7 : vector<8x128xf32>
    %c136 = arith.constant 136 : index
    %c0_7 = arith.constant 0 : index
    %9 = vector.load %arg1[%c136, %c0_7] : memref<264x128xf32, #tpu.memory_space<vmem>>, vector<128x128xf32>
    %cst_8 = arith.constant dense<0.000000e+00> : vector<8x128xf32>
    %10 = tpu.matmul %8, %9, %cst_8 {dimension_numbers = #tpu.dot_dimension_numbers<[1], [0], [0], [1], [0, 0, 1, 1], [], []>} : vector<8x128xf32>, vector<128x128xf32>, vector<8x128xf32> -> vector<8x128xf32>
    %c0_9 = arith.constant 0 : index
    %c0_10 = arith.constant 0 : index
    %11 = vector.load %arg2[%c0_9, %c0_10] : memref<8x128xf32, #tpu.memory_space<vmem>>, vector<8x128xf32>
    tpu.vector_store %arg2[%c0_9, %c0_10], %10 {strides = array<i32>} : memref<8x128xf32, #tpu.memory_space<vmem>>, vector<8x128xf32>,
    return
  }
}

</mosaic_0001>

<bundles_post_ra>
// kernel: torch_network_forward.1
= control target key start
LH: loop header
LB: loop body
LE: loop exit
PB: predicated region body
PF: predicated region fallthrough
CT: control target
= control target key end

     0   :  { %7 = vsyncpa [#allocation3], 0  ;;  %s420_s9 = smov [#allocation2]   ;;  %s488_s0 = inlined_call_operand.vmem [shape: f32[8,8], index: 0, kind: input, shape index: {}]   ;;  %s489_s1 = inlined_call_operand.hbm [shape: f32[264,128], index: 1, kind: input, shape index: {}]   ;;  %s490_s2 = inlined_call_operand.vmem [shape: f32[8,128], index: 2, kind: output, shape index: {}]  }
   0x1   :  { %s15_s10 = sshll.u32 %s420_s9, 4  ;;  %s16_s10 = int_to_ptr.vmem [resolvable:$true] %s15_s10 }
   0x2   :  { %s406_s11 = scalar_lea.vmem %s16_s10, 4224  ;;  %p411_p1 = scmp.lt.s32.totalorder %s16_s10, %s16_s10 }
   0x3   :  { %p407_p0 = scmp.ne.s32.totalorder %s16_s10, %s406_s11  ;;  %p412_p2 = scmp.lt.s32.totalorder %s406_s11, %s406_s11 }
   0x5   :  { %p413_p3 = por %p412_p2, %p411_p1 }
   0x7   :  { %p414_p4 = pnand %p413_p3, %p407_p0 }
   0x9   :  { %417 = shalt.err (!%p414_p4)
}
   0xa   :  { %s421_s12 = smov 128   ;;  %s422_s13 = smov 8  }
   0xb   :  { %21 = dma.hbm_to_vmem [thread:$0]  %s489_s1, 4224, %s16_s10, [#allocation3], %s421_s12, %s421_s12, %s422_s13  }
   0xc   :  { %418 = dma.done.wait [#allocation3], 4224  }
   0xd   :  { %419 = vsyncadd [#allocation3], 4294963072  ;;  %v423_v0 = vmov 0.0   ;;  %vm424_vm0 = vmmov 0   ;;  %vm27_vm1 = vcmask 64512   ;;  %v26_v1 = vld [vmem:[#allocation2] sm:$0xff] }
   0xe   :  { %318 = vmatprep.subr.mxu0 %v423_v0  ;;  %320 = vmatprep.mubr.msk.f32.mxu0 %vm424_vm0, %v423_v0  ;;  %v25_v2 = vld [vmem:[%s488_s0] sm:$0xff]  ;;  %v116_v4 = vld [vmem:[#allocation2 + $0x78] sm:$0xff]  ;;  %v115_v5 = vld [vmem:[#allocation2 + $0x70] sm:$0xff] }
   0xf   :  { %323 = vmatprep.subr.mxu1 %v423_v0  ;;  %355 = vmatprep.mubr.msk.f32.mxu1 %vm424_vm0, %v423_v0  ;;  %v117_v3 = vld [vmem:[#allocation2 + $0x80] sm:$0xff]  ;;  %v114_v6 = vld [vmem:[#allocation2 + $0x68] sm:$0xff]  ;;  %v112_v8 = vld [vmem:[#allocation2 + $0x58] sm:$0xff] }
  0x10   :  { %319 = vmatpush3.msra.mxu0 %v26_v1  ;;  %324 = vmatpush3.msra.mxu1 %v117_v3  ;;  %v113_v7 = vld [vmem:[#allocation2 + $0x60] sm:$0xff]  ;;  %v111_v9 = vld [vmem:[#allocation2 + $0x50] sm:$0xff]  ;;  %v110_v10 = vld [vmem:[#allocation2 + $0x48] sm:$0xff] }
  0x11   :  { %321 = vmatmul.mubr.msk.f32.vlgmr.msra.gmra.mxu0 %vm27_vm1, %v25_v2  ;;  %325 = vmatprep.subr.mxu1 %v423_v0  ;;  %v109_v11 = vld [vmem:[#allocation2 + $0x40] sm:$0xff]  ;;  %v108_v12 = vld [vmem:[#allocation2 + $0x38] sm:$0xff]  ;;  %v107_v13 = vld [vmem:[#allocation2 + $0x30] sm:$0xff] }
  0x12   :  { %326 = vmatpush3.msra.mxu1 %v116_v4  ;;  %358 = vmatprep.subr.mxu0 %v423_v0  ;;  %v106_v14 = vld [vmem:[#allocation2 + $0x28] sm:$0xff]  ;;  %v105_v15 = vld [vmem:[#allocation2 + $0x20] sm:$0xff]  ;;  %v104_v16 = vld [vmem:[#allocation2 + $0x18] sm:$0xff] }
  0x13   :  { %327 = vmatprep.subr.mxu1 %v423_v0  ;;  %390 = vmatprep.mubr.msk.f32.mxu0 %vm424_vm0, %v423_v0  ;;  %v103_v17 = vld [vmem:[#allocation2 + $0x10] sm:$0xff]  ;;  %v102_v18 = vld [vmem:[#allocation2 + $0x8] sm:$0xff]  ;;  %v204_v19 = vld [vmem:[#allocation2 + $0x100] sm:$0xff] }
  0x14   :  { %328 = vmatpush3.msra.mxu1 %v115_v5  ;;  %v203_v20 = vld [vmem:[#allocation2 + $0xf8] sm:$0xff]  ;;  %359 = vmatpush3.msra.mxu0 %v204_v19  ;;  %v202_v21 = vld [vmem:[#allocation2 + $0xf0] sm:$0xff]  ;;  %v201_v22 = vld [vmem:[#allocation2 + $0xe8] sm:$0xff] }
  0x15   :  { %329 = vmatprep.subr.mxu1 %v423_v0  ;;  %360 = vmatprep.subr.mxu0 %v423_v0  ;;  %v200_v23 = vld [vmem:[#allocation2 + $0xe0] sm:$0xff]  ;;  %v199_v24 = vld [vmem:[#allocation2 + $0xd8] sm:$0xff]  ;;  %v198_v25 = vld [vmem:[#allocation2 + $0xd0] sm:$0xff] }
  0x16   :  { %330 = vmatpush3.msra.mxu1 %v114_v6  ;;  %361 = vmatpush3.msra.mxu0 %v203_v20  ;;  %v197_v26 = vld [vmem:[#allocation2 + $0xc8] sm:$0xff]  ;;  %v196_v27 = vld [vmem:[#allocation2 + $0xc0] sm:$0xff]  ;;  %v195_v28 = vld [vmem:[#allocation2 + $0xb8] sm:$0xff] }
  0x17   :  { %331 = vmatprep.subr.mxu1 %v423_v0  ;;  %362 = vmatprep.subr.mxu0 %v423_v0  ;;  %v194_v29 = vld [vmem:[#allocation2 + $0xb0] sm:$0xff]  ;;  %v193_v30 = vld [vmem:[#allocation2 + $0xa8] sm:$0xff]  ;;  %v192_v31 = vld [vmem:[#allocation2 + $0xa0] sm:$0xff] }
  0x18   :  { %332 = vmatpush3.msra.mxu1 %v113_v7  ;;  %363 = vmatpush3.msra.mxu0 %v202_v21  ;;  %v191_v32 = vld [vmem:[#allocation2 + $0x98] sm:$0xff]  ;;  %v190_v36 = vld [vmem:[#allocation2 + $0x90] sm:$0xff]  ;;  %v189_v37 = vld [vmem:[#allocation2 + $0x88] sm:$0xff] }
  0x19   :  { %333 = vmatprep.subr.mxu1 %v423_v0  ;;  %364 = vmatprep.subr.mxu0 %v423_v0 }
  0x1a   :  { %334 = vmatpush3.msra.mxu1 %v112_v8  ;;  %365 = vmatpush3.msra.mxu0 %v201_v22 }
  0x1b   :  { %335 = vmatprep.subr.mxu1 %v423_v0  ;;  %366 = vmatprep.subr.mxu0 %v423_v0 }
  0x1c   :  { %336 = vmatpush3.msra.mxu1 %v111_v9  ;;  %367 = vmatpush3.msra.mxu0 %v200_v23 }
  0x1d   :  { %337 = vmatprep.subr.mxu1 %v423_v0  ;;  %368 = vmatprep.subr.mxu0 %v423_v0 }
  0x1e   :  { %338 = vmatpush3.msra.mxu1 %v110_v10  ;;  %369 = vmatpush3.msra.mxu0 %v199_v24 }
  0x1f   :  { %339 = vmatprep.subr.mxu1 %v423_v0  ;;  %370 = vmatprep.subr.mxu0 %v423_v0 }
  0x20   :  { %340 = vmatpush3.msra.mxu1 %v109_v11  ;;  %371 = vmatpush3.msra.mxu0 %v198_v25 }
  0x21   :  { %341 = vmatprep.subr.mxu1 %v423_v0  ;;  %372 = vmatprep.subr.mxu0 %v423_v0 }
  0x22   :  { %342 = vmatpush3.msra.mxu1 %v108_v12  ;;  %373 = vmatpush3.msra.mxu0 %v197_v26 }
  0x23   :  { %343 = vmatprep.subr.mxu1 %v423_v0  ;;  %374 = vmatprep.subr.mxu0 %v423_v0 }
  0x24   :  { %344 = vmatpush3.msra.mxu1 %v107_v13  ;;  %375 = vmatpush3.msra.mxu0 %v196_v27 }
  0x25   :  { %345 = vmatprep.subr.mxu1 %v423_v0  ;;  %376 = vmatprep.subr.mxu0 %v423_v0 }
  0x26   :  { %346 = vmatpush3.msra.mxu1 %v106_v14  ;;  %377 = vmatpush3.msra.mxu0 %v195_v28 }
  0x27   :  { %347 = vmatprep.subr.mxu1 %v423_v0  ;;  %378 = vmatprep.subr.mxu0 %v423_v0 }
  0x28   :  { %348 = vmatpush3.msra.mxu1 %v105_v15  ;;  %379 = vmatpush3.msra.mxu0 %v194_v29 }
  0x29   :  { %349 = vmatprep.subr.mxu1 %v423_v0  ;;  %380 = vmatprep.subr.mxu0 %v423_v0 }
  0x2a   :  { %350 = vmatpush3.msra.mxu1 %v104_v16  ;;  %381 = vmatpush3.msra.mxu0 %v193_v30 }
  0x2b   :  { %351 = vmatprep.subr.mxu1 %v423_v0  ;;  %382 = vmatprep.subr.mxu0 %v423_v0 }
  0x2c   :  { %352 = vmatpush3.msra.mxu1 %v103_v17  ;;  %383 = vmatpush3.msra.mxu0 %v192_v31 }
  0x2d   :  { %353 = vmatprep.subr.mxu1 %v423_v0  ;;  %384 = vmatprep.subr.mxu0 %v423_v0 }
  0x2e   :  { %354 = vmatpush3.msra.mxu1 %v102_v18  ;;  %385 = vmatpush3.msra.mxu0 %v191_v32 }
  0x2f   :  { %386 = vmatprep.subr.mxu0 %v423_v0 }
  0x30   :  { %387 = vmatpush3.msra.mxu0 %v190_v36 }
  0x31   :  { %388 = vmatprep.subr.mxu0 %v423_v0 }
  0x32   :  { %389 = vmatpush3.msra.mxu0 %v189_v37 }
  0xd1   :  { %v97_v33 = vpop.f32.mrf.mxu0 }
  0xd2   :  { %v101_v34 = vmax.f32 %v97_v33, 0.0 }
  0xd3   :  { %v322_v35 = vpop.f32.mrf.mxu0 }
  0xd4   :  { %356 = vmatmul.mubr.f32.vlgmr.msra.gmra.mxu1 %v101_v34 }
 0x194   :  { %v184_v38 = vpop.f32.mrf.mxu1 }
 0x195   :  { %v188_v39 = vmax.f32 %v184_v38, 0.0 }
 0x196   :  { %v357_v40 = vpop.f32.mrf.mxu1 }
 0x197   :  { %391 = vmatmul.mubr.f32.vlgmr.msra.gmra.mxu0 %v188_v39 }
 0x257   :  { %v271_v41 = vpop.f32.mrf.mxu0 }
 0x258   :  { %275 = vst [vmem:[%s490_s2] sm:$0xff] %v271_v41 }
 0x259   :  { %v392_v42 = vpop.f32.mrf.mxu0 }
 0x25a   :  { %280 = vsyncpa [#allocation3], 1 }

</bundles_post_ra>
